<compile_context>
chip_gen: v7x
topology: tpu7x:2x2x1
jax: 0.10.0
libtpu: 0.0.40
codegen_flags: <defaults>
</compile_context>

<pallas_src>
import functools

import jax
import jax.numpy as jnp
from jax import lax
from jax.experimental import pallas as pl
from jax.experimental.pallas import tpu as pltpu

KSIZE = 5
PAD = (KSIZE - 1) // 2
_SUBC = 8     # channels reduced per jnp.max/jnp.sum statement (bounds temporaries)
_CMAX = 128   # cap on channels per grid step


def _vmem_capacity_bytes():
    try:
        return int(pltpu.get_tpu_info().vmem_capacity_bytes)
    except Exception:
        return 64 << 20  # conservative default (v7x per-TC VMEM)


def _divisors_desc(n, cap):
    return [d for d in range(min(n, cap), 0, -1) if n % d == 0]


def _choose_blocks(N, C, H, W, itemsize, budget_bytes):
    """Pick (cblk, hblk) for the pooling kernel's x block (cblk, hblk, W)."""
    hmin = 8 if H % 8 == 0 else H
    cblk = 1
    for d in _divisors_desc(C, _CMAX):
        if d * hmin * W * itemsize <= budget_bytes or d == 1:
            cblk = d
            break
    if H % 8 != 0:
        hblk = H  # full-extent second-minor dim (no (8,128) issue)
    else:
        max_rows = max(8, budget_bytes // max(cblk * W * itemsize, 1))
        cands = [d for d in range(8, H + 1, 8) if H % d == 0]
        fit = [d for d in cands if d <= max_rows]
        hblk = max(fit) if fit else min(cands)
        # Single image: split rows so both v7x TensorCores stream disjoint slabs.
        if N == 1 and hblk == H and len(cands) >= 2:
            hblk = sorted(cands)[-2]
    return cblk, hblk


def _channel_pool_kernel(x_ref, o_ref, max_ref, sum_ref, *, c_total):
    # x_ref:   VMEM (1, cblk, hblk, W)   one channel/row chunk of one image
    # o_ref:   VMEM (1, 2, hblk, W) f32  pooled [max, mean] maps
    # max_ref: VMEM (hblk, W) f32        running channel max
    # sum_ref: VMEM (hblk, W) f32        running channel sum
    c_idx = pl.program_id(2)

    @pl.when(c_idx == 0)
    def _init():
        max_ref[...] = jnp.full(max_ref.shape, -jnp.inf, dtype=jnp.float32)
        sum_ref[...] = jnp.zeros(sum_ref.shape, dtype=jnp.float32)

    cblk = x_ref.shape[1]
    for c0 in range(0, cblk, _SUBC):
        sc = min(_SUBC, cblk - c0)
        xs = x_ref[0, c0:c0 + sc].astype(jnp.float32)      # (sc, hblk, W)
        max_ref[...] = jnp.maximum(max_ref[...], jnp.max(xs, axis=0))
        sum_ref[...] = sum_ref[...] + jnp.sum(xs, axis=0)

    @pl.when(c_idx == pl.num_programs(2) - 1)
    def _finalize():
        o_ref[0, 0] = max_ref[...]
        o_ref[0, 1] = sum_ref[...] * jnp.float32(1.0 / c_total)


def _spatial_conv_kernel(w_ref, p_ref, o_ref, pad_ref):
    # w_ref:   SMEM (2*K*K,) f32          conv weights, [in_ch, kh, kw] flat
    # p_ref:   VMEM (1, 2, H, W) f32      pooled [max, mean] maps for one image
    # o_ref:   VMEM (1, 1, H, W)          sigmoid attention map
    # pad_ref: VMEM (2, H+2P, W+2P) f32   zero-padded conv input (scratch)
    H, W = p_ref.shape[2], p_ref.shape[3]

    pad_ref[...] = jnp.zeros(pad_ref.shape, dtype=jnp.float32)
    pad_ref[0, PAD:PAD + H, PAD:PAD + W] = p_ref[0, 0]
    pad_ref[1, PAD:PAD + H, PAD:PAD + W] = p_ref[0, 1]

    acc = jnp.zeros((H, W), jnp.float32)
    for ci in range(2):
        for kh in range(KSIZE):
            for kw in range(KSIZE):
                wgt = w_ref[ci * KSIZE * KSIZE + kh * KSIZE + kw]
                acc = acc + wgt * pad_ref[ci, kh:kh + H, kw:kw + W]

    o_ref[0, 0] = jax.nn.sigmoid(acc).astype(o_ref.dtype)


def spatial_attn_layer(x, conv_w):
    """x: (N, C, H, W); conv_w: (1, 2, K, K). Returns scale: (N, 1, H, W)."""
    N, C, H, W = x.shape
    itemsize = x.dtype.itemsize

    vmem_cap = _vmem_capacity_bytes()
    block_budget = max(2 << 20, vmem_cap // 5)
    cblk, hblk = _choose_blocks(N, C, H, W, itemsize, block_budget)
    n_cblk = C // cblk
    n_hblk = H // hblk

    # --- kernel A: streaming channel max/mean pooling ------------------------
    row_f32 = hblk * W * 4
    x_block = cblk * hblk * W * itemsize
    vmem_a = int(2 * x_block            # double-buffered x chunk
                 + 2 * 2 * row_f32      # double-buffered pooled output block
                 + 2 * row_f32          # max/sum scratch
                 + (_SUBC + 4) * row_f32  # f32 sub-chunk temporaries
                 + (4 << 20))           # headroom
    vmem_a = min(max(vmem_a, 8 << 20), int(vmem_cap * 0.9))

    pooled = pl.pallas_call(
        functools.partial(_channel_pool_kernel, c_total=C),
        out_shape=jax.ShapeDtypeStruct((N, 2, H, W), jnp.float32),
        grid_spec=pltpu.PrefetchScalarGridSpec(
            num_scalar_prefetch=0,
            grid=(N, n_hblk, n_cblk),
            in_specs=[
                pl.BlockSpec((1, cblk, hblk, W), lambda n, h, c: (n, c, h, 0)),
            ],
            out_specs=pl.BlockSpec((1, 2, hblk, W), lambda n, h, c: (n, 0, h, 0)),
            scratch_shapes=[
                pltpu.VMEM((hblk, W), jnp.float32),   # running channel max
                pltpu.VMEM((hblk, W), jnp.float32),   # running channel sum
            ],
        ),
        compiler_params=pltpu.CompilerParams(
            dimension_semantics=("parallel", "parallel", "arbitrary"),
            vmem_limit_bytes=vmem_a,
        ),
    )(x)

    # --- kernel B: per-image 5x5 conv (2 -> 1) + sigmoid ----------------------
    w_flat = conv_w.reshape(-1).astype(jnp.float32)   # (2*K*K,)

    conv_scratch = 2 * (H + 2 * PAD) * (W + 2 * PAD) * 4
    vmem_b = int(2 * 2 * H * W * 4 + 2 * H * W * itemsize + conv_scratch + (16 << 20))
    vmem_b = min(max(vmem_b, 8 << 20), int(vmem_cap * 0.9))

    scale = pl.pallas_call(
        _spatial_conv_kernel,
        out_shape=jax.ShapeDtypeStruct((N, 1, H, W), x.dtype),
        grid_spec=pltpu.PrefetchScalarGridSpec(
            num_scalar_prefetch=0,
            grid=(N,),
            in_specs=[
                pl.BlockSpec(memory_space=pltpu.MemorySpace.SMEM),        # weights
                pl.BlockSpec((1, 2, H, W), lambda n: (n, 0, 0, 0)),       # pooled
            ],
            out_specs=pl.BlockSpec((1, 1, H, W), lambda n: (n, 0, 0, 0)),
            scratch_shapes=[
                pltpu.VMEM((2, H + 2 * PAD, W + 2 * PAD), jnp.float32),
            ],
        ),
        compiler_params=pltpu.CompilerParams(
            dimension_semantics=("parallel",),
            vmem_limit_bytes=vmem_b,
        ),
    )(w_flat, pooled)

    return scale


def _reference(x, conv_w):
    # ChannelPool: cat(max over C, mean over C) -> (N, 2, H, W), then conv+sigmoid
    pooled = jnp.concatenate(
        [jnp.max(x, axis=1, keepdims=True), jnp.mean(x, axis=1, keepdims=True)],
        axis=1,
    )
    y = lax.conv_general_dilated(
        pooled.astype(jnp.float32),
        conv_w.astype(jnp.float32),
        window_strides=(1, 1),
        padding=[(PAD, PAD), (PAD, PAD)],
        dimension_numbers=("NCHW", "OIHW", "NCHW"),
    )
    return jax.nn.sigmoid(y).astype(x.dtype)


if __name__ == "__main__":
    key = jax.random.PRNGKey(0)
    kx, kw = jax.random.split(key)

    N, C, H, W = 2, 4, 16, 16
    x = jax.random.normal(kx, (N, C, H, W), dtype=jnp.float32)
    # Conv2d(2, 1, kernel_size=5, bias=False) weight, deterministic init
    conv_w = (jax.random.normal(kw, (1, 2, KSIZE, KSIZE), dtype=jnp.float32)
              * (1.0 / (2 * KSIZE * KSIZE) ** 0.5))

    out = spatial_attn_layer(x, conv_w)
    out = jax.block_until_ready(out)

    ref = _reference(x, conv_w)
    assert out.shape == (N, 1, H, W)
    assert jnp.allclose(out, ref, atol=1e-5, rtol=1e-5), "mismatch vs JAX reference"

    print("KERNEL_OK")
</pallas_src>

<mosaic_0001>
module attributes {stable_mosaic.version = 11 : i64} {
  func.func @_channel_pool_kernel(%arg0: i32, %arg1: i32, %arg2: i32, %arg3: memref<1x4x16x16xf32, #tpu.memory_space<vmem>>, %arg4: memref<1x2x16x16xf32, #tpu.memory_space<vmem>>, %arg5: memref<16x16xf32, #tpu.memory_space<vmem>>, %arg6: memref<16x16xf32, #tpu.memory_space<vmem>>) attributes {dimension_semantics = [#tpu.dimension_semantics<parallel>, #tpu.dimension_semantics<parallel>, #tpu.dimension_semantics<arbitrary>], iteration_bounds = array<i64: 2, 1, 1>, scalar_prefetch = 0 : i64, scratch_operands = 2 : i64, tpu.core_type = #tpu.core_type<tc>, window_params = [{transform_indices = @transform_0, window_bounds = array<i64: 1, 4, 16, 16>}, {transform_indices = @transform_1, window_bounds = array<i64: 1, 2, 16, 16>}]} {
    %c0_i32 = arith.constant 0 : i32
    %0 = arith.cmpi eq, %arg2, %c0_i32 : i32
    %1 = arith.extui %0 : i1 to i32
    %c0_i32_0 = arith.constant 0 : i32
    %2 = arith.cmpi ne, %1, %c0_i32_0 : i32
    scf.if %2 {
      %cst_15 = arith.constant 0xFF800000 : f32
      %16 = vector.broadcast %cst_15 : f32 to vector<16x16xf32>
      %c0_16 = arith.constant 0 : index
      %c0_17 = arith.constant 0 : index
      %17 = vector.load %arg5[%c0_16, %c0_17] : memref<16x16xf32, #tpu.memory_space<vmem>>, vector<16x16xf32>
      tpu.vector_store %arg5[%c0_16, %c0_17], %16 {strides = array<i32>} : memref<16x16xf32, #tpu.memory_space<vmem>>, vector<16x16xf32>,
      %cst_18 = arith.constant 0.000000e+00 : f32
      %18 = vector.broadcast %cst_18 : f32 to vector<16x16xf32>
      %c0_19 = arith.constant 0 : index
      %c0_20 = arith.constant 0 : index
      %19 = vector.load %arg6[%c0_19, %c0_20] : memref<16x16xf32, #tpu.memory_space<vmem>>, vector<16x16xf32>
      tpu.vector_store %arg6[%c0_19, %c0_20], %18 {strides = array<i32>} : memref<16x16xf32, #tpu.memory_space<vmem>>, vector<16x16xf32>,
    } else {
    }
    %c0 = arith.constant 0 : index
    %c0_1 = arith.constant 0 : index
    %c0_2 = arith.constant 0 : index
    %c0_3 = arith.constant 0 : index
    %3 = vector.load %arg3[%c0, %c0_1, %c0_2, %c0_3] : memref<1x4x16x16xf32, #tpu.memory_space<vmem>>, vector<1x4x16x16xf32>
    %4 = vector.shape_cast %3 : vector<1x4x16x16xf32> to vector<4x16x16xf32>
    %c0_4 = arith.constant 0 : index
    %c0_5 = arith.constant 0 : index
    %5 = vector.load %arg5[%c0_4, %c0_5] : memref<16x16xf32, #tpu.memory_space<vmem>>, vector<16x16xf32>
    %cst = arith.constant dense<0xFF800000> : vector<16x16xf32>
    %6 = vector.multi_reduction <maximumf>, %4, %cst [0] : vector<4x16x16xf32> to vector<16x16xf32>
    %7 = arith.maximumf %5, %6 : vector<16x16xf32>
    %c0_6 = arith.constant 0 : index
    %c0_7 = arith.constant 0 : index
    %8 = vector.load %arg5[%c0_6, %c0_7] : memref<16x16xf32, #tpu.memory_space<vmem>>, vector<16x16xf32>
    tpu.vector_store %arg5[%c0_6, %c0_7], %7 {strides = array<i32>} : memref<16x16xf32, #tpu.memory_space<vmem>>, vector<16x16xf32>,
    %c0_8 = arith.constant 0 : index
    %c0_9 = arith.constant 0 : index
    %9 = vector.load %arg6[%c0_8, %c0_9] : memref<16x16xf32, #tpu.memory_space<vmem>>, vector<16x16xf32>
    %cst_10 = arith.constant dense<0.000000e+00> : vector<16x16xf32>
    %10 = vector.multi_reduction <add>, %4, %cst_10 [0] : vector<4x16x16xf32> to vector<16x16xf32>
    %11 = arith.addf %9, %10 : vector<16x16xf32>
    %c0_11 = arith.constant 0 : index
    %c0_12 = arith.constant 0 : index
    %12 = vector.load %arg6[%c0_11, %c0_12] : memref<16x16xf32, #tpu.memory_space<vmem>>, vector<16x16xf32>
    tpu.vector_store %arg6[%c0_11, %c0_12], %11 {strides = array<i32>} : memref<16x16xf32, #tpu.memory_space<vmem>>, vector<16x16xf32>,
    %c0_i32_13 = arith.constant 0 : i32
    %13 = arith.cmpi eq, %arg2, %c0_i32_13 : i32
    %14 = arith.extui %13 : i1 to i32
    %c0_i32_14 = arith.constant 0 : i32
    %15 = arith.cmpi ne, %14, %c0_i32_14 : i32
    scf.if %15 {
      %c0_15 = arith.constant 0 : index
      %c0_16 = arith.constant 0 : index
      %16 = vector.load %arg5[%c0_15, %c0_16] : memref<16x16xf32, #tpu.memory_space<vmem>>, vector<16x16xf32>
      %c0_17 = arith.constant 0 : index
      %c0_18 = arith.constant 0 : index
      %c0_19 = arith.constant 0 : index
      %c0_20 = arith.constant 0 : index
      %17 = vector.load %arg4[%c0_17, %c0_18, %c0_19, %c0_20] : memref<1x2x16x16xf32, #tpu.memory_space<vmem>>, vector<1x1x16x16xf32>
      %18 = vector.shape_cast %17 : vector<1x1x16x16xf32> to vector<16x16xf32>
      %19 = vector.shape_cast %16 : vector<16x16xf32> to vector<1x1x16x16xf32>
      tpu.vector_store %arg4[%c0_17, %c0_18, %c0_19, %c0_20], %19 {strides = array<i32>} : memref<1x2x16x16xf32, #tpu.memory_space<vmem>>, vector<1x1x16x16xf32>,
      %c0_21 = arith.constant 0 : index
      %c0_22 = arith.constant 0 : index
      %20 = vector.load %arg6[%c0_21, %c0_22] : memref<16x16xf32, #tpu.memory_space<vmem>>, vector<16x16xf32>
      %cst_23 = arith.constant 2.500000e-01 : f32
      %21 = vector.broadcast %cst_23 : f32 to vector<16x16xf32>
      %22 = arith.mulf %20, %21 : vector<16x16xf32>
      %c0_24 = arith.constant 0 : index
      %c1 = arith.constant 1 : index
      %c0_25 = arith.constant 0 : index
      %c0_26 = arith.constant 0 : index
      %23 = vector.load %arg4[%c0_24, %c1, %c0_25, %c0_26] : memref<1x2x16x16xf32, #tpu.memory_space<vmem>>, vector<1x1x16x16xf32>
      %24 = vector.shape_cast %23 : vector<1x1x16x16xf32> to vector<16x16xf32>
      %25 = vector.shape_cast %22 : vector<16x16xf32> to vector<1x1x16x16xf32>
      tpu.vector_store %arg4[%c0_24, %c1, %c0_25, %c0_26], %25 {strides = array<i32>} : memref<1x2x16x16xf32, #tpu.memory_space<vmem>>, vector<1x1x16x16xf32>,
    } else {
    }
    return
  }
  func.func @transform_0(%arg0: i32, %arg1: i32, %arg2: i32) -> (i32, i32, i32, i32) {
    %c0_i32 = arith.constant 0 : i32
    %c0_i32_0 = arith.constant 0 : i32
    return %arg0, %arg2, %arg1, %c0_i32 : i32, i32, i32, i32
  }
  func.func @transform_1(%arg0: i32, %arg1: i32, %arg2: i32) -> (i32, i32, i32, i32) {
    %c0_i32 = arith.constant 0 : i32
    %c0_i32_0 = arith.constant 0 : i32
    %c0_i32_1 = arith.constant 0 : i32
    return %arg0, %c0_i32, %arg1, %c0_i32_0 : i32, i32, i32, i32
  }
}

</mosaic_0001>

<bundles_post_ra>
// kernel: tpu_custom_call.1
= control target key start
LH: loop header
LB: loop body
LE: loop exit
PB: predicated region body
PF: predicated region fallthrough
CT: control target
= control target key end

     0   :  { %6 = vsyncpa [#allocation5], 0  ;;  %s771_s0 = inlined_call_operand.hbm [shape: f32[2,4,16,16], index: 0, kind: input, shape index: {}]   ;;  %s772_s1 = inlined_call_operand.hbm [shape: f32[2,2,16,16], index: 1, kind: output, shape index: {}]  }
   0x1   :  { %8 = vsyncpa [#allocation5 + $0x1], 0 }
   0x2   :  { %9 = vsyncpa [#allocation6], 0 }
   0x3   :  { %11 = vsyncpa [#allocation6 + $0x1], 0  ;;  %s567_s6 = smov 0   ;;  %s569_s7 = smov 0  }
   0x4   :  { %s571_s8 = smov 0   ;;  %s573_s9 = smov 0  }
   0x5   :  { %s575_s10 = smov 0   ;;  %s577_s11 = smov 0  }
   0x6 LB: > { %s348_s12 = sadd.s32 4294967295, %s547_s11   ;;  %s349_s13 = sadd.s32 4294967294, %s547_s11   ;;  %s547_s11 = sphi %s577_s11, %s17_s11   ;;  %s543_s10 = sphi %s575_s10, %s787_s10   ;;  %s539_s9 = sphi %s573_s9, %s786_s9   ;;  %s535_s8 = sphi %s571_s8, %s785_s8   ;;  %s531_s7 = sphi %s569_s7, %s784_s7   ;;  %s527_s6 = sphi %s567_s6, %s783_s6  }
   0x7   : > { %s36_s14 = sadd.s32 1, %s543_s10  ;;  %s47_s15 = sadd.s32 1, %s535_s8 }
   0x8   : > { %p38_p0 = scmp.ge.s32.totalorder %s36_s14, 2  ;;  %p54_p1 = scmp.ne.s32.totalorder %s535_s8, %s531_s7 }
   0x9   : > { %p55_p2 = scmp.eq.s32.totalorder %s547_s11, 0  ;;  %p60_p3 = scmp.ne.s32.totalorder %s531_s7, %s527_s6 }
   0xa   : > { %s789_s14 = smov (%p38_p0, %s36_s14), 0  ;;  %p61_p5 = scmp.eq.s32.totalorder %s348_s12, 0 }
   0xb   : > { %p608_p4 = por %p55_p2, %p54_p1  ;;  %s40_s17 = ssub.s32 %s543_s10, %s789_s14 }
   0xc   : > { %p86_p6 = scmp.eq.s32.totalorder %s348_s12, 1  ;;  %p45_p7 = scmp.eq.s32.totalorder %s40_s17, 0 }
   0xd   : > { %p614_p8 = por %p61_p5, %p60_p3  ;;  %p92_p10 = scmp.eq.s32.totalorder %s349_s13, 1 }
   0xe   : > { %p618_p9 = por %p86_p6, %p54_p1  ;;  %p379_p13 = scmp.lt.s32.totalorder %s547_s11, 2 }
   0xf   : > { %s623_s20 = scalar_select %p45_p7, %s535_s8, %s47_s15  }
  0x10   : > { %s776_s19 = scalar_select %p618_p9, 1, 0 }
  0x11   : > { %p625_p11 = por %p92_p10, %p60_p3  ;;  %s112_s22 = sand.u32 1, %s535_s8  }
  0x12   : > { %s352_s23 = sshll.u32 %s112_s22, 6  ;;  %s365_s24 = sshll.u32 %s543_s10, 10 }
  0x13   : > { %s777_s21 = scalar_select %p625_p11, 1, 0 }
  0x14   : > { %s636_s27 = scalar_lea.hbm %s771_s0, %s365_s24  ;;  %s116_s28 = scalar_lea.vmem [#allocation4], %s352_s23 }
  0x15   : > { %s128_s29 = sshll.u32 %s116_s28, 4  ;;  %p642_p0 = pnand %p379_p13, %p608_p4  ;;  %s638_s29 = int_to_ptr.vmem [resolvable:$true] %s128_s29 }
  0x16   : > { %s647_s2 = scalar_lea.sflag [#allocation5], %s112_s22  ;;  %s435_s3 = scalar_lea.hbm %s636_s27, 1024 }
  0x17   : > { %p436_p2 = scmp.ne.s32.totalorder %s636_s27, %s435_s3  ;;  %p437_p3 = pneg %p642_p0 }
  0x18   : > { %s440_s12 = scalar_lea.hbm %s771_s0, 2048  ;;  %p441_p4 = scmp.lt.u32.totalorder %s636_s27, %s771_s0 }
  0x19   : > { %p438_p5 = pnand %p437_p3, %p436_p2  ;;  %p442_p7 = scmp.lt.u32.totalorder %s440_s12, %s435_s3 }
  0x1a   : > { %p444_p13 = scmp.lt.u32.totalorder %s435_s3, %s636_s27 }
  0x1b   : > { %p439_p6 = pneg %p438_p5  ;;  %p443_p10 = por %p442_p7, %p441_p4 }
  0x1d   : > { %p445_p12 = por %p444_p13, %p443_p10 }
  0x1f   : > { %p446_p1 = pnand %p445_p12, %p439_p6 }
  0x21   : > { %449 = shalt.err (!%p446_p1)
}
  0x22   : > { %s450_s16 = scalar_lea.vmem %s638_s29, 1024  ;;  %s549_s17 = smov [#allocation4]  }
  0x23   : > { %p451_p2 = scmp.ne.s32.totalorder %s638_s29, %s450_s16  ;;  %s455_s22 = sshll.u32 %s549_s17, 4  ;;  %s456_s22 = int_to_ptr.vmem [resolvable:$false] %s455_s22 }
  0x24   : > { %s457_s23 = scalar_lea.vmem %s456_s22, 2048  ;;  %p458_p9 = scmp.lt.s32.totalorder %s638_s29, %s456_s22 }
  0x25   : > { %p453_p5 = pnand %p451_p2, %p437_p3  ;;  %p459_p4 = scmp.lt.s32.totalorder %s457_s23, %s450_s16 }
  0x27   : > { %p454_p11 = pneg %p453_p5  ;;  %p460_p7 = por %p459_p4, %p458_p9 }
  0x29   : > { %p461_p10 = pnand %p460_p7, %p454_p11 }
  0x2b   : > { %464 = shalt.err (!%p461_p10)
}
  0x2c   : > { %s550_s24 = smov 128   ;;  %s551_s25 = smov 8  }
  0x2d   : > { %374 = dma.hbm_to_vmem [thread:$0]  (!%p642_p0), %s636_s27, 1024, %s638_s29, %s647_s2, %s550_s24, %s550_s24, %s551_s25  }
  0x2e   : > { %p136_p12 = scmp.lt.s32.totalorder %s547_s11, 3  ;;  %p779_p1 = scmp.ge.s32.totalorder %s547_s11, 1 }
  0x30   : > { %p137_p3 = pnand %p779_p1, %p136_p12 }
  0x31   : > { %s679_s26 = sand.u32 (!%p137_p3), 1, %s531_s7  }
  0x32   : > { %140 = sbr.rel (%p137_p3) target bundleno = 95 (0x5f), region = 24  ;;  %s356_s28 = sshll.u32 (!%p137_p3), %s679_s26, 6 }
  0x33   : > { %s143_s3 = scalar_lea.sflag (!%p137_p3), [#allocation5], %s679_s26  ;;  %s146_s4 = scalar_lea.vmem (!%p137_p3), [#allocation4], %s356_s28 }
  0x39   : > { %518 = dma.done.wait (%p614_p8), %s143_s3, 1024  }
  0x3a   : > { %520 = vsyncadd (%p614_p8), %s143_s3, 4294966272  ;;  %vm172_vm0 = vcmask 130048   ;;  %v552_v0 = vmov 0.0   ;;  %v553_v1 = vmov -inf   ;;  %v177_v2 = vld [vmem:[%s146_s4] sm:$0xff]  ;;  %v179_v3 = vld [vmem:[%s146_s4 + $0x10] sm:$0xff] }
  0x3b   : > { %175 = vst.msk [vmem:[#allocation3] sm:$0xff] %vm172_vm0, %v552_v0  ;;  %176 = vst.msk [vmem:[#allocation3 + $0x8] sm:$0xff] %vm172_vm0, %v552_v0  ;;  %v181_v4 = vld [vmem:[%s146_s4 + $0x20] sm:$0xff]  ;;  %v183_v5 = vld [vmem:[%s146_s4 + $0x30] sm:$0xff]  ;;  %v208_v6 = vsel %vm172_vm0, %v177_v2, 0.0  ;;  %v209_v7 = vsel %vm172_vm0, %v179_v3, 0.0 }
  0x3c   : > { %173 = vst.msk [vmem:[#allocation2] sm:$0xff] %vm172_vm0, %v553_v1  ;;  %174 = vst.msk [vmem:[#allocation2 + $0x8] sm:$0xff] %vm172_vm0, %v553_v1  ;;  %v211_v8 = vsel %vm172_vm0, %v181_v4, 0.0  ;;  %v178_v9 = vld [vmem:[%s146_s4 + $0x8] sm:$0xff]  ;;  %v210_v10 = vadd.f32 %v209_v7, %v208_v6  ;;  %v213_v11 = vsel %vm172_vm0, %v183_v5, 0.0  ;;  %v180_v12 = vld [vmem:[%s146_s4 + $0x18] sm:$0xff] }
  0x3d   : > { %v182_v13 = vld [vmem:[%s146_s4 + $0x28] sm:$0xff]  ;;  %v184_v14 = vld [vmem:[%s146_s4 + $0x38] sm:$0xff]  ;;  %v215_v15 = vsel %vm172_vm0, %v178_v9, 0.0  ;;  %v188_v16 = vsel %vm172_vm0, %v177_v2, -inf  ;;  %v216_v17 = vsel %vm172_vm0, %v180_v12, 0.0  ;;  %v189_v20 = vsel %vm172_vm0, %v179_v3, -inf }
  0x3e   : > { %v218_v18 = vsel %vm172_vm0, %v182_v13, 0.0  ;;  %v220_v19 = vsel %vm172_vm0, %v184_v14, 0.0  ;;  %v212_v21 = vadd.f32 %v211_v8, %v210_v10  ;;  %v217_v22 = vadd.f32 %v216_v17, %v215_v15  ;;  %s357_s18 = sshll.u32 %s679_s26, 5  ;;  %s366_s30 = sshll.u32 %s539_s9, 9 }
  0x3f   : > { %v190_v23 = vsel %vm172_vm0, %v181_v4, -inf  ;;  %v192_v24 = vsel %vm172_vm0, %v183_v5, -inf  ;;  %v195_v28 = vsel %vm172_vm0, %v178_v9, -inf  ;;  %v196_v29 = vsel %vm172_vm0, %v180_v12, -inf  ;;  %s164_s27 = scalar_lea.vmem [#allocation7], %s357_s18  ;;  %s719_s12 = scalar_lea.hbm %s772_s1, %s366_s30 }
  0x40   : > { %v191_v26 = vmax.f32 %v188_v16, %v190_v23  ;;  %v193_v27 = vmax.f32 %v189_v20, %v192_v24  ;;  %v214_v30 = vadd.f32 %v213_v11, %v212_v21  ;;  %v219_v31 = vadd.f32 %v218_v18, %v217_v22  ;;  %s256_s29 = sshll.u32 %s164_s27, 4  ;;  %s241_s9 = scalar_lea.sflag [#allocation6], %s679_s26  ;;  %s714_s29 = int_to_ptr.vmem [resolvable:$true] %s256_s29 }
  0x41   : > { %v197_v33 = vsel %vm172_vm0, %v182_v13, -inf  ;;  %v199_v34 = vsel %vm172_vm0, %v184_v14, -inf  ;;  %s465_s13 = scalar_lea.vmem %s714_s29, 512  ;;  %p780_p9 = scmp.ne.s32.totalorder %s776_s19, 0 }
  0x42   : > { %v206_v25 = vld [vmem:[#allocation3] sm:$0xff]  ;;  %v207_v35 = vld [vmem:[#allocation3 + $0x8] sm:$0xff]  ;;  %v194_v36 = vmax.f32 %v191_v26, %v193_v27  ;;  %v198_v37 = vmax.f32 %v195_v28, %v197_v33  ;;  %v200_v38 = vmax.f32 %v196_v29, %v199_v34  ;;  %v221_v40 = vadd.f32 %v220_v19, %v219_v31  ;;  %p466_p8 = scmp.ne.s32.totalorder %s714_s29, %s465_s13  ;;  %s554_s15 = smov [#allocation7]  }
  0x43   : > { %v185_v32 = vld [vmem:[#allocation2] sm:$0xff]  ;;  %v222_v39 = vadd.f32 %v214_v30, %v206_v25  ;;  %v186_v41 = vld [vmem:[#allocation2 + $0x8] sm:$0xff]  ;;  %s469_s16 = sshll.u32 %s554_s15, 4  ;;  %s470_s16 = int_to_ptr.vmem [resolvable:$false] %s469_s16 }
  0x44   : > { %v202_v42 = vmax.f32 %v185_v32, %v194_v36  ;;  %v201_v43 = vmax.f32 %v198_v37, %v200_v38  ;;  %v223_v44 = vadd.f32 %v221_v40, %v207_v35  ;;  %p467_p11 = pnand %p466_p8, %p780_p9  ;;  %s471_s17 = scalar_lea.vmem %s470_s16, 1024 }
  0x45   : > { %224 = vst.msk [vmem:[#allocation3] sm:$0xff] %vm172_vm0, %v222_v39  ;;  %p472_p6 = scmp.lt.s32.totalorder %s714_s29, %s470_s16  ;;  %p473_p13 = scmp.lt.s32.totalorder %s471_s17, %s465_s13 }
  0x46   : > { %204 = vst.msk [vmem:[#allocation2] sm:$0xff] %vm172_vm0, %v202_v42  ;;  %v203_v45 = vmax.f32 %v186_v41, %v201_v43  ;;  %225 = vst.msk [vmem:[#allocation3 + $0x8] sm:$0xff] %vm172_vm0, %v223_v44  ;;  %p468_p0 = pneg %p467_p11 }
  0x47   : > { %p474_p2 = por %p473_p13, %p472_p6 }
  0x48   : > { %205 = vst.msk [vmem:[#allocation2 + $0x8] sm:$0xff] %vm172_vm0, %v203_v45 }
  0x49   : > { %p475_p5 = pnand %p474_p2, %p468_p0 }
  0x4c   : > { %v233_v46 = vld [vmem:[#allocation3] sm:$0xff] }
  0x4d   : > { %v229_v47 = vld [vmem:[#allocation2] sm:$0xff]  ;;  %v235_v48 = vmul.f32 0.25, %v233_v46  ;;  %v234_v49 = vld [vmem:[#allocation3 + $0x8] sm:$0xff] }
  0x4e   : > { %231 = vst.msk [vmem:[%s164_s27] sm:$0xff] %vm172_vm0, %v229_v47  ;;  %v236_v51 = vmul.f32 0.25, %v234_v49 }
  0x4f   : > { %v230_v50 = vld [vmem:[#allocation2 + $0x8] sm:$0xff]  ;;  %358 = vst.msk [vmem:[%s164_s27 + $0x10] sm:$0xff] %vm172_vm0, %v235_v48 }
  0x50   : > { %232 = vst.msk [vmem:[%s164_s27 + $0x8] sm:$0xff] %vm172_vm0, %v230_v50  ;;  %359 = vst.msk [vmem:[%s164_s27 + $0x18] sm:$0xff] %vm172_vm0, %v236_v51 }
  0x51   : > { %478 = shalt.err (!%p475_p5)
}
  0x52   : > { %s479_s22 = scalar_lea.hbm %s719_s12, 512  ;;  %s483_s25 = scalar_lea.hbm %s772_s1, 1024 }
  0x53   : > { %p480_p4 = scmp.ne.s32.totalorder %s719_s12, %s479_s22  ;;  %p484_p12 = scmp.lt.u32.totalorder %s719_s12, %s772_s1 }
  0x54   : > { %p485_p1 = scmp.lt.u32.totalorder %s483_s25, %s479_s22  ;;  %p487_p8 = scmp.lt.u32.totalorder %s479_s22, %s719_s12 }
  0x55   : > { %p481_p7 = pnand %p480_p4, %p780_p9 }
  0x56   : > { %p486_p3 = por %p485_p1, %p484_p12 }
  0x57   : > { %p482_p10 = pneg %p481_p7 }
  0x58   : > { %p488_p11 = por %p487_p8, %p486_p3 }
  0x5a   : > { %p489_p0 = pnand %p488_p11, %p482_p10 }
  0x5c   : > { %492 = shalt.err (!%p489_p0)
}
  0x5d   : > { %s555_s4 = smov 128   ;;  %s556_s18 = smov 8  }
  0x5e   : > { %369 = dma.vmem_to_hbm [thread:$0]  (%p780_p9), %s714_s29, 512, %s719_s12, %s241_s9, %s555_s4, %s555_s4, %s556_s18  }
  0x5f PF: > { %s271_s27 = sand.u32 1, %s527_s6   ;;  %p781_p6 = scmp.ne.s32.totalorder %s777_s21, 0 }
  0x60   : > { %p782_p13 = scmp.ge.s32.totalorder %s547_s11, 2  ;;  %s272_s30 = scalar_lea.sflag [#allocation6], %s271_s27 }
  0x62   : > { %p376_p2 = pnand %p782_p13, %p781_p6 }
  0x64   : > { %522 = dma.done.wait (!%p376_p2), %s272_s30, 512  }
  0x65   : > { %524 = vsyncadd (!%p376_p2), %s272_s30, 4294966784  ;;  %s17_s11 = sadd.s32 1, %s547_s11   ;;  %s783_s6 = smov %s531_s7 }
  0x66   : > { %p14_p5 = scmp.ge.s32.totalorder %s17_s11, 4   ;;  %s784_s7 = smov %s535_s8 }
  0x67   : > { %s785_s8 = smov %s623_s20  ;;  %s786_s9 = smov %s543_s10 }
  0x68   : > { %s787_s10 = smov %s789_s14  ;;  %16 = sbr.rel (!%p14_p5) target bundleno = 6 (0x6), region = 78 }
  0x6f   :  { %277 = vsyncpa [#allocation5], 1 }
  0x70   :  { %279 = vsyncpa [#allocation5 + $0x1], 1 }
  0x71   :  { %280 = vsyncpa [#allocation6], 1 }
  0x72   :  { %282 = vsyncpa [#allocation6 + $0x1], 1 }

</bundles_post_ra>
